<compile_context>
chip_gen: v7x
topology: tpu7x:2x2x1
jax: 0.10.0
libtpu: 0.0.40
codegen_flags: <defaults>
</compile_context>

<pallas_src>
import jax
import jax.numpy as jnp
from jax.experimental import pallas as pl
from jax.experimental.pallas import tpu as pltpu

_SUBLANE = 8  # vreg sublane width (second-to-last dim granularity)


def _round_up(n, m):
    return (n + m - 1) // m * m


def _vmem_capacity_bytes():
    """Generation-aware VMEM capacity (v5e/v6e: 128 MiB, v7x per-TC: 64 MiB)."""
    try:
        cap = int(pltpu.get_tpu_info().vmem_capacity_bytes)
        if cap > 0:
            return cap
    except Exception:
        pass
    return 64 << 20  # conservative fallback (v7x per-TC size)


def _vmem_footprint(tb, F, H, C):
    """Kernel VMEM footprint for a batch tile of `tb` rows (counts the 2 default
    pipeline buffers on every input, including the constant-index weights)."""
    return (2 * tb * F * 4             # double-buffered f32 x tiles
            + 2 * (F * H + H * C) * 2  # W1/W2: 2 pipeline buffers each, bf16
            + 2 * (H + C) * 4          # b1/b2: 2 pipeline buffers each, f32
            + 2 * tb * C * 4           # double-buffered f32 output tiles
            + tb * (F + H) * 2         # bf16 x / h matmul operands
            + tb * H * 4)              # f32 hidden activation


def _choose_block_b(B, F, H, C, budget_bytes):
    """Largest batch tile (multiple of 8, <= 4096) whose footprint fits the budget."""
    tb = min(4096, _round_up(B, _SUBLANE))
    while tb > _SUBLANE and _vmem_footprint(tb, F, H, C) > budget_bytes:
        tb //= 2
    return max(_round_up(tb, _SUBLANE), _SUBLANE)


def _mlp_kernel(x_ref, w1_ref, b1_ref, w2_ref, b2_ref, o_ref):
    # Fused: logits = relu(x @ W1 + b1) @ W2 + b2
    # bf16 operands on the MXU, f32 accumulation; bias/ReLU in f32 on the VPU.
    x = x_ref[...].astype(jnp.bfloat16)                    # in-kernel cast (VPU)
    h = jnp.dot(x, w1_ref[...], preferred_element_type=jnp.float32)
    h = jnp.maximum(h + b1_ref[...], 0.0)                  # ReLU, f32
    logits = jnp.dot(h.astype(jnp.bfloat16), w2_ref[...],
                     preferred_element_type=jnp.float32)
    o_ref[...] = logits + b2_ref[...]


def asym_view_pair_classifier(x, w1, b1, w2, b2, *, block_b=None):
    """Forward pass of AsymViewPairClassifier.

    x  : [B, F]  (2-D, per the module's `assert x.dim() == 2`)
    w1 : [F, H], b1 : [1, H] (or [H])
    w2 : [H, C], b2 : [1, C] (or [C])
    returns logits [B, C] (float32)
    """
    assert x.ndim == 2, "AsymViewPairClassifier expects a 2-D input"
    B, F = x.shape
    H = w1.shape[1]
    C = w2.shape[1]
    assert w1.shape[0] == F and w2.shape[0] == H

    # Weights/biases: tiny, VMEM-resident -> cast once in the wrapper.
    w1b = w1.astype(jnp.bfloat16)
    w2b = w2.astype(jnp.bfloat16)
    b1f = jnp.reshape(b1, (1, H)).astype(jnp.float32)
    b2f = jnp.reshape(b2, (1, C)).astype(jnp.float32)

    vmem_cap = _vmem_capacity_bytes()
    budget = int(vmem_cap * 0.5)          # tile-choice budget (generous headroom)

    if block_b is None:
        TB = _choose_block_b(B, F, H, C, budget)
    else:
        TB = max(_SUBLANE, _round_up(block_b, _SUBLANE))

    # v7x megacore: guarantee >= 2 grid steps so ("parallel",) can shard the
    # batch across both TensorCores (harmless on 1-TC v5e/v6e).
    if TB >= B and B > _SUBLANE:
        TB = _round_up(-(-B // 2), _SUBLANE)

    grid = (pl.cdiv(B, TB),)              # partial last block -> masked stores

    # Scheduling hint: true (unpadded) HBM traffic.
    cost = pl.CostEstimate(
        flops=2 * B * (F * H + H * C),
        transcendentals=0,
        bytes_accessed=(B * F * x.dtype.itemsize
                        + (F * H + H * C) * 2 + (H + C) * 4
                        + B * C * 4),
    )

    vmem_need = _vmem_footprint(TB, F, H, C)
    # ~48 MiB ceiling on v7x, ~96 MiB on v5e/v6e; always >= the real footprint.
    vmem_limit = int(min(int(vmem_cap * 0.75), max(32 << 20, 2 * vmem_need)))

    out = pl.pallas_call(
        _mlp_kernel,
        out_shape=jax.ShapeDtypeStruct((B, C), jnp.float32),
        grid=grid,
        in_specs=[
            pl.BlockSpec((TB, F), lambda i: (i, 0)),   # x: streamed f32, double-buffered
            pl.BlockSpec((F, H), lambda i: (0, 0)),    # W1: VMEM-resident bf16
            pl.BlockSpec((1, H), lambda i: (0, 0)),    # b1: VMEM-resident f32
            pl.BlockSpec((H, C), lambda i: (0, 0)),    # W2: VMEM-resident bf16
            pl.BlockSpec((1, C), lambda i: (0, 0)),    # b2: VMEM-resident f32
        ],
        out_specs=pl.BlockSpec((TB, C), lambda i: (i, 0)),  # unpadded C, masked vst
        compiler_params=pltpu.CompilerParams(
            dimension_semantics=("parallel",),          # megacore sharding on v7x
            vmem_limit_bytes=vmem_limit,
        ),
        cost_estimate=cost,
    )(x, w1b, b1f, w2b, b2f)

    return out


def init_params(key, in_features, hidden, n_classes):
    """Deterministic synthetic parameter init (matches PyTorch Linear shapes,
    stored transposed as [in, out] for the kernel)."""
    k1, k2, k3, k4 = jax.random.split(key, 4)
    w1 = jax.random.normal(k1, (in_features, hidden), jnp.float32) * (1.0 / jnp.sqrt(in_features))
    b1 = jax.random.normal(k2, (1, hidden), jnp.float32) * 0.01
    w2 = jax.random.normal(k3, (hidden, n_classes), jnp.float32) * (1.0 / jnp.sqrt(hidden))
    b2 = jax.random.normal(k4, (1, n_classes), jnp.float32) * 0.01
    return w1, b1, w2, b2


if __name__ == "__main__":
    key = jax.random.PRNGKey(0)
    kx, kp = jax.random.split(key)

    # Small shapes consistent with the module; batch chosen as a non-multiple of
    # the tile to exercise the multi-step grid + partial-last-block (masked store)
    # path: grid = cdiv(200, 64) = 4, last block has 8 valid rows.
    batch, in_features, hidden, n_classes = 200, 32, 64, 6
    x = jax.random.normal(kx, (batch, in_features), jnp.float32)
    w1, b1, w2, b2 = init_params(kp, in_features, hidden, n_classes)

    logits = asym_view_pair_classifier(x, w1, b1, w2, b2, block_b=64)
    logits = jax.block_until_ready(logits)

    # Pure-JAX reference following the same bf16-operand / f32-accumulate path.
    xb = x.astype(jnp.bfloat16).astype(jnp.float32)
    w1r = w1.astype(jnp.bfloat16).astype(jnp.float32)
    w2r = w2.astype(jnp.bfloat16).astype(jnp.float32)
    h_ref = jnp.maximum(xb @ w1r + b1, 0.0)
    ref = h_ref.astype(jnp.bfloat16).astype(jnp.float32) @ w2r + b2

    assert logits.shape == (batch, n_classes)
    err = float(jnp.max(jnp.abs(logits - ref)))
    assert jnp.allclose(logits, ref, atol=1e-2, rtol=1e-2), err

    print("KERNEL_OK")
</pallas_src>

<mosaic_0001>
module attributes {stable_mosaic.version = 11 : i64} {
  func.func @_mlp_kernel(%arg0: i32, %arg1: memref<64x32xf32, #tpu.memory_space<vmem>>, %arg2: memref<32x64xbf16, #tpu.memory_space<vmem>>, %arg3: memref<1x64xf32, #tpu.memory_space<vmem>>, %arg4: memref<64x6xbf16, #tpu.memory_space<vmem>>, %arg5: memref<1x6xf32, #tpu.memory_space<vmem>>, %arg6: memref<64x6xf32, #tpu.memory_space<vmem>>) attributes {dimension_semantics = [#tpu.dimension_semantics<parallel>], iteration_bounds = array<i64: 4>, scalar_prefetch = 0 : i64, scratch_operands = 0 : i64, tpu.core_type = #tpu.core_type<tc>, window_params = [{transform_indices = @transform_0, window_bounds = array<i64: 64, 32>}, {pipeline_mode = #tpu.pipeline_mode<synchronous>, transform_indices = @transform_1, window_bounds = array<i64: 32, 64>}, {pipeline_mode = #tpu.pipeline_mode<synchronous>, transform_indices = @transform_2, window_bounds = array<i64: 1, 64>}, {pipeline_mode = #tpu.pipeline_mode<synchronous>, transform_indices = @transform_3, window_bounds = array<i64: 64, 6>}, {pipeline_mode = #tpu.pipeline_mode<synchronous>, transform_indices = @transform_4, window_bounds = array<i64: 1, 6>}, {transform_indices = @transform_5, window_bounds = array<i64: 64, 6>}]} {
    %c0 = arith.constant 0 : index
    %c0_0 = arith.constant 0 : index
    %0 = vector.load %arg1[%c0, %c0_0] : memref<64x32xf32, #tpu.memory_space<vmem>>, vector<64x32xf32>
    %1 = arith.truncf %0 : vector<64x32xf32> to vector<64x32xbf16>
    %c0_1 = arith.constant 0 : index
    %c0_2 = arith.constant 0 : index
    %2 = vector.load %arg2[%c0_1, %c0_2] : memref<32x64xbf16, #tpu.memory_space<vmem>>, vector<32x64xbf16>
    %cst = arith.constant dense<0.000000e+00> : vector<64x64xf32>
    %3 = tpu.matmul %1, %2, %cst {dimension_numbers = #tpu.dot_dimension_numbers<[1], [0], [0], [1], [0, 0, 1, 1], [], []>} : vector<64x32xbf16>, vector<32x64xbf16>, vector<64x64xf32> -> vector<64x64xf32>
    %c0_3 = arith.constant 0 : index
    %c0_4 = arith.constant 0 : index
    %4 = vector.load %arg3[%c0_3, %c0_4] : memref<1x64xf32, #tpu.memory_space<vmem>>, vector<1x64xf32>
    %5 = vector.broadcast %4 : vector<1x64xf32> to vector<64x64xf32>
    %6 = arith.addf %3, %5 : vector<64x64xf32>
    %cst_5 = arith.constant 0.000000e+00 : f32
    %7 = vector.broadcast %cst_5 : f32 to vector<64x64xf32>
    %8 = arith.maximumf %6, %7 : vector<64x64xf32>
    %9 = arith.truncf %8 : vector<64x64xf32> to vector<64x64xbf16>
    %c0_6 = arith.constant 0 : index
    %c0_7 = arith.constant 0 : index
    %10 = vector.load %arg4[%c0_6, %c0_7] : memref<64x6xbf16, #tpu.memory_space<vmem>>, vector<64x6xbf16>
    %cst_8 = arith.constant dense<0.000000e+00> : vector<64x6xf32>
    %11 = tpu.matmul %9, %10, %cst_8 {dimension_numbers = #tpu.dot_dimension_numbers<[1], [0], [0], [1], [0, 0, 1, 1], [], []>} : vector<64x64xbf16>, vector<64x6xbf16>, vector<64x6xf32> -> vector<64x6xf32>
    %c0_9 = arith.constant 0 : index
    %c0_10 = arith.constant 0 : index
    %12 = vector.load %arg5[%c0_9, %c0_10] : memref<1x6xf32, #tpu.memory_space<vmem>>, vector<1x6xf32>
    %13 = vector.broadcast %12 : vector<1x6xf32> to vector<64x6xf32>
    %14 = arith.addf %11, %13 : vector<64x6xf32>
    %c0_11 = arith.constant 0 : index
    %c0_12 = arith.constant 0 : index
    %15 = vector.load %arg6[%c0_11, %c0_12] : memref<64x6xf32, #tpu.memory_space<vmem>>, vector<64x6xf32>
    tpu.vector_store %arg6[%c0_11, %c0_12], %14 {strides = array<i32>} : memref<64x6xf32, #tpu.memory_space<vmem>>, vector<64x6xf32>,
    return
  }
  func.func @transform_0(%arg0: i32) -> (i32, i32) {
    %c0_i32 = arith.constant 0 : i32
    %c0_i32_0 = arith.constant 0 : i32
    return %arg0, %c0_i32 : i32, i32
  }
  func.func @transform_1(%arg0: i32) -> (i32, i32) {
    %c0_i32 = arith.constant 0 : i32
    %c0_i32_0 = arith.constant 0 : i32
    %c0_i32_1 = arith.constant 0 : i32
    return %c0_i32, %c0_i32_0 : i32, i32
  }
  func.func @transform_2(%arg0: i32) -> (i32, i32) {
    %c0_i32 = arith.constant 0 : i32
    %c0_i32_0 = arith.constant 0 : i32
    %c0_i32_1 = arith.constant 0 : i32
    return %c0_i32, %c0_i32_0 : i32, i32
  }
  func.func @transform_3(%arg0: i32) -> (i32, i32) {
    %c0_i32 = arith.constant 0 : i32
    %c0_i32_0 = arith.constant 0 : i32
    %c0_i32_1 = arith.constant 0 : i32
    return %c0_i32, %c0_i32_0 : i32, i32
  }
  func.func @transform_4(%arg0: i32) -> (i32, i32) {
    %c0_i32 = arith.constant 0 : i32
    %c0_i32_0 = arith.constant 0 : i32
    %c0_i32_1 = arith.constant 0 : i32
    return %c0_i32, %c0_i32_0 : i32, i32
  }
  func.func @transform_5(%arg0: i32) -> (i32, i32) {
    %c0_i32 = arith.constant 0 : i32
    %c0_i32_0 = arith.constant 0 : i32
    return %arg0, %c0_i32 : i32, i32
  }
}

</mosaic_0001>

<bundles_post_ra>
// kernel: tpu_custom_call.1
= control target key start
LH: loop header
LB: loop body
LE: loop exit
PB: predicated region body
PF: predicated region fallthrough
CT: control target
= control target key end

     0   :  { %s1038_s18 = smov 0   ;;  %s1040_s19 = smov 0   ;;  %s1183_s0 = inlined_call_operand.vmem [shape: f32[200,32], index: 0, kind: input, shape index: {}]   ;;  %s1184_s1 = inlined_call_operand.vmem [shape: bf16[32,64], index: 1, kind: input, shape index: {}]   ;;  %s1185_s2 = inlined_call_operand.vmem [shape: f32[1,64], index: 2, kind: input, shape index: {}]   ;;  %s1186_s3 = inlined_call_operand.vmem [shape: bf16[64,6], index: 3, kind: input, shape index: {}]   ;;  %s1187_s4 = inlined_call_operand.vmem [shape: f32[1,6], index: 4, kind: input, shape index: {}]   ;;  %s1188_s5 = inlined_call_operand.vmem [shape: f32[200,6], index: 5, kind: output, shape index: {}]  }
   0x1   :  { %s1042_s20 = smov 0  }
   0x2 LB: > { %s1051_s21 = sadd.s32 4294967295, %s974_s20   ;;  %s1053_s22 = sadd.s32 1, %s974_s20   ;;  %s974_s20 = sphi %s1042_s20, %s1195_s20   ;;  %s970_s19 = sphi %s1040_s19, %s1194_s19   ;;  %s966_s18 = sphi %s1038_s18, %s1193_s18  }
   0x3   : > { %s129_s23 = ssub.s32 %s974_s20, %s1053_s22  ;;  %s132_s24 = sadd.s32 1, %s970_s19 }
   0x4   : > { %p130_p0 = scmp.eq.s32.totalorder %s129_s23, 0  ;;  %p142_p1 = scmp.ne.s32.totalorder %s970_s19, %s966_s18 }
   0x5   : > { %p143_p2 = scmp.eq.s32.totalorder %s1051_s21, 3  ;;  %p744_p3 = scmp.ge.s32.totalorder %s974_s20, 1 }
   0x6   : > { %s1061_s25 = scalar_select %p130_p0, %s970_s19, %s132_s24  }
   0x7   : > { %p1063_p4 = por %p143_p2, %p142_p1  ;;  %p196_p5 = scmp.lt.s32.totalorder %s974_s20, 5 }
   0x9   : > { %p197_p6 = pnand %p744_p3, %p196_p5 }
   0xa   : > { %v914_v0 = vld [vmem:[%s1184_s1] sm:$0xff] (!%p197_p6)   ;;  %s1071_s29 = sshll.u32 (!%p197_p6), %s1051_s21, 3  ;;  %v915_v1 = vld [vmem:[%s1184_s1 + $0x8] sm:$0xff] (!%p197_p6)   ;;  %vm282_vm0 = vcmask (!%p197_p6), 261120   ;;  %v918_v16 = vld [vmem:[%s1186_s3 + $0x10] sm:$0xff] (!%p197_p6)   ;;  %vm411_vm1 = vcmask (!%p197_p6), 523264  }
   0xb   : > { %200 = sbr.rel (%p197_p6) target bundleno = 523 (0x20b), region = 40  ;;  %p232_p7 = scmp.lt.s32.totalorder (!%p197_p6), %s1071_s29, 24  ;;  %798 = vmatprep.subr.bf16.mxu0 (!%p197_p6), %v914_v0  ;;  %v916_v2 = vld [vmem:[%s1186_s3] sm:$0xff] (!%p197_p6)   ;;  %v917_v3 = vld [vmem:[%s1186_s3 + $0x8] sm:$0xff] (!%p197_p6)   ;;  %v919_v17 = vld [vmem:[%s1186_s3 + $0x18] sm:$0xff] (!%p197_p6)   ;;  %vm489_vm2 = vcmask (!%p197_p6), 48128  }
   0xc   : > { %799 = vmatpush3.bf16.msra.mxu0 (!%p197_p6), %v914_v0  ;;  %810 = vmatprep.subr.bf16.mxu1 (!%p197_p6), %v916_v2  ;;  %v748_v18 = vld [vmem:[%s1185_s2] ss:$0 sm:$0xff] (!%p197_p6)  ;;  %s224_s28 = sand.u32 (!%p197_p6), 1, %s966_s18  }
   0xd   : > { %800 = vmatprep.subr.bf16.mxu0 (!%p197_p6), %v915_v1  ;;  %811 = vmatpush3.bf16.msra.mxu1 (!%p197_p6), %v916_v2  ;;  %s745_s30 = sshll.u32 (!%p197_p6), %s224_s28, 6  ;;  %v755_v47 = vld [vmem:[%s1187_s4] ss:$0 sm:$0xff] (!%p197_p6) }
   0xe   : > { %812 = vmatprep.subr.bf16.mxu1 (!%p197_p6), %v917_v3  ;;  %s1104_s8 = scalar_lea.vmem (!%p197_p6), [#allocation2], %s745_s30  }
  0x10   : > { %801 = vmatpush3.bf16.msra.mxu0 (!%p197_p6), %v915_v1 }
  0x11   : > { %813 = vmatpush3.bf16.msra.mxu1 (!%p197_p6), %v917_v3 }
  0x12   : > { %s233_s9 = scalar_select %p232_p7, %s1071_s29, 24  ;;  %814 = vmatprep.subr.bf16.mxu1 %v918_v16 }
  0x13   : > { %s506_s18 = ssub.s32 (%p1063_p4), 25, %s1071_s29 }
  0x14   : > { %s747_s12 = sshll.u32 %s233_s9, 3  ;;  %s781_s9 = sshll.u32 (%p1063_p4), %s1051_s21, 6 }
  0x15   : > { %s235_s15 = scalar_lea.vmem %s1183_s0, %s747_s12  ;;  %815 = vmatpush3.bf16.msra.mxu1 %v918_v16  ;;  %p507_p8 = scmp.lt.s32.totalorder (%p1063_p4), %s506_s18, 8 }
  0x16   : > { %v247_v4 = vld [vmem:[%s235_s15] sm:$0xff]  ;;  %v248_v5 = vld [vmem:[%s235_s15 + $0x8] sm:$0xff]  ;;  %v249_v6 = vld [vmem:[%s235_s15 + $0x10] sm:$0xff]  ;;  %816 = vmatprep.subr.bf16.mxu1 %v919_v17  ;;  %s1129_s12 = scalar_lea.vmem (%p1063_p4), %s1188_s5, %s781_s9  }
  0x17   : > { %v255_v7 = vpack.c.bf16 %v248_v5, %v247_v4  ;;  %v250_v8 = vld [vmem:[%s235_s15 + $0x18] sm:$0xff]  ;;  %v251_v9 = vld [vmem:[%s235_s15 + $0x20] sm:$0xff]  ;;  %v252_v10 = vld [vmem:[%s235_s15 + $0x28] sm:$0xff] }
  0x18   : > { %v256_v11 = vpack.c.bf16 %v250_v8, %v249_v6  ;;  %v257_v12 = vpack.c.bf16 %v252_v10, %v251_v9  ;;  %v253_v13 = vld [vmem:[%s235_s15 + $0x30] sm:$0xff]  ;;  %v254_v14 = vld [vmem:[%s235_s15 + $0x38] sm:$0xff] }
  0x19   : > { %802 = vmatprep.mubr.msk.bf16.mxu0 %vm282_vm0, %v255_v7  ;;  %v258_v15 = vpack.c.bf16 %v254_v14, %v253_v13  ;;  %817 = vmatpush3.bf16.msra.mxu1 %v919_v17 }
  0x1a   : > { %803 = vmatmul.mubr.msk.bf16.vlgmr.msra.gmra.mrb[0].mxu0 %vm282_vm0, %v256_v11 }
  0x1b   : > { %806 = vmatprep.mubr.msk.bf16.mxu0 %vm282_vm0, %v257_v12 }
  0x22   : > { %807 = vmatmul.mubr.msk.bf16.gmra.mrb[4].mxu0 %vm282_vm0, %v258_v15 }
  0xed   : > { %v804_v19 = vpop.f32.mrb[0].mxu0 }
  0xee   : > { %v338_v20 = vadd.f32 %v804_v19, %v748_v18  ;;  %v329_v21 = vpop.f32.mrb[1].mxu0 }
  0xef   : > { %v330_v22 = vadd.f32 %v748_v18, %v329_v21  ;;  %v805_v23 = vpop.f32.mrb[2].mxu0 }
  0xf0   : > { %v341_v24 = vadd.f32 %v805_v23, %v748_v18  ;;  %v332_v25 = vpop.f32.mrb[3].mxu0  ;;  %v362_v27 = vmax.f32 %v338_v20, 0.0 }
  0xf1   : > { %v333_v26 = vadd.f32 %v748_v18, %v332_v25  ;;  %v360_v29 = vmax.f32 %v330_v22, 0.0 }
  0xf2   : > { %v363_v28 = vmax.f32 %v341_v24, 0.0 }
  0xf3   : > { %v361_v30 = vmax.f32 %v333_v26, 0.0 }
  0xf4   : > { %v369_v31 = vpack.c.bf16 %v363_v28, %v362_v27 }
  0xf5   : > { %v808_v32 = vpop.f32.mrb[4].mxu0  ;;  %v368_v33 = vpack.c.bf16 %v361_v30, %v360_v29 }
  0xf6   : > { %v354_v34 = vadd.f32 %v808_v32, %v748_v18  ;;  %v345_v35 = vpop.f32.mrb[5].mxu0 }
  0xf7   : > { %v346_v36 = vadd.f32 %v748_v18, %v345_v35  ;;  %v809_v37 = vpop.f32.mrb[6].mxu0  ;;  %818 = vmatprep.mubr.msk.bf16.mxu1 %vm411_vm1, %v368_v33 }
  0xf8   : > { %v357_v38 = vadd.f32 %v809_v37, %v748_v18  ;;  %v348_v39 = vpop.f32.mrb[7].mxu0  ;;  %819 = vmatmul.mubr.msk.bf16.vlgmr.msra.gmra.mrb[0].mxu1 %vm411_vm1, %v369_v31  ;;  %v366_v41 = vmax.f32 %v354_v34, 0.0 }
  0xf9   : > { %v349_v40 = vadd.f32 %v748_v18, %v348_v39  ;;  %v364_v43 = vmax.f32 %v346_v36, 0.0 }
  0xfa   : > { %v367_v42 = vmax.f32 %v357_v38, 0.0 }
  0xfb   : > { %v365_v44 = vmax.f32 %v349_v40, 0.0 }
  0xfc   : > { %v371_v45 = vpack.c.bf16 %v367_v42, %v366_v41 }
  0xfd   : > { %v370_v46 = vpack.c.bf16 %v365_v44, %v364_v43 }
  0xff   : > { %822 = vmatprep.mubr.msk.bf16.mxu1 %vm411_vm1, %v370_v46 }
 0x100   : > { %823 = vmatmul.mubr.msk.bf16.gmra.mrb[4].mxu1 %vm411_vm1, %v371_v45 }
 0x1cb   : > { %v820_v48 = vpop.f32.mrb[0].mxu1 }
 0x1cc   : > { %v467_v49 = vadd.f32 %v820_v48, %v755_v47  ;;  %v458_v50 = vpop.f32.mrb[1].mxu1 }
 0x1cd   : > { %v459_v51 = vadd.f32 %v755_v47, %v458_v50  ;;  %v821_v52 = vpop.f32.mrb[2].mxu1 }
 0x1ce   : > { %492 = vst.msk [vmem:[%s1104_s8 + $0x10] sm:$0xff] %vm489_vm2, %v467_v49  ;;  %v470_v53 = vadd.f32 %v821_v52, %v755_v47  ;;  %v461_v54 = vpop.f32.mrb[3].mxu1 }
 0x1cf   : > { %490 = vst.msk [vmem:[%s1104_s8] sm:$0xff] %vm489_vm2, %v459_v51  ;;  %v462_v55 = vadd.f32 %v755_v47, %v461_v54 }
 0x1d0   : > { %493 = vst.msk [vmem:[%s1104_s8 + $0x18] sm:$0xff] %vm489_vm2, %v470_v53 }
 0x1d1   : > { %491 = vst.msk [vmem:[%s1104_s8 + $0x8] sm:$0xff] %vm489_vm2, %v462_v55 }
 0x1d3   : > { %v824_v56 = vpop.f32.mrb[4].mxu1  ;;  %504 = sbr.rel (!%p1063_p4) target bundleno = 523 (0x20b), region = 44 }
 0x1d4   : > { %v483_v57 = vadd.f32 %v824_v56, %v755_v47  ;;  %v474_v58 = vpop.f32.mrb[5].mxu1 }
 0x1d5   : > { %v475_v59 = vadd.f32 %v755_v47, %v474_v58  ;;  %v825_v60 = vpop.f32.mrb[6].mxu1 }
 0x1d6   : > { %496 = vst.msk [vmem:[%s1104_s8 + $0x30] sm:$0xff] %vm489_vm2, %v483_v57  ;;  %v486_v61 = vadd.f32 %v825_v60, %v755_v47  ;;  %v477_v62 = vpop.f32.mrb[7].mxu1 }
 0x1d7   : > { %494 = vst.msk [vmem:[%s1104_s8 + $0x20] sm:$0xff] %vm489_vm2, %v475_v59  ;;  %v478_v63 = vadd.f32 %v755_v47, %v477_v62 }
 0x1d8   : > { %497 = vst.msk [vmem:[%s1104_s8 + $0x38] sm:$0xff] %vm489_vm2, %v486_v61 }
 0x1d9   : > { %495 = vst.msk [vmem:[%s1104_s8 + $0x28] sm:$0xff] %vm489_vm2, %v478_v63 }
 0x1da   : > { %s1197_s18 = smov (!%p507_p8, %s506_s18), 8 }
 0x1db   : > { %s766_s13 = sshll.u32 %s1197_s18, 7 }
 0x1dc   : > { %p769_p9 = scmp.eq.s32.totalorder %s766_s13, 0 }
 0x1dd   : > { %s1135_s14 = sshrl.u32 (!%p769_p9), %s1197_s18, 3 }
 0x1de   : > { %515 = sbr.rel (%p769_p9) target bundleno = 523 (0x20b), region = 48  ;;  %p770_p10 = scmp.le.s32.totalorder (!%p769_p9), %s1135_s14, 0 }
 0x1e5   : > { %697 = sbr.rel (%p770_p10) target bundleno = 502 (0x1f6), region = 124  ;;  %s1190_s21 = smov (!%p770_p10), %s1129_s12 }
 0x1e6   : > { %s1191_s26 = smov (!%p770_p10), %s1104_s8  ;;  %s1144_s29 = smov (!%p770_p10), 0  }
 0x1e7   : > { %s1146_s15 = smov (!%p770_p10), 0  }
 0x1ec LB: >> { %v591_v0 = vld [vmem:[%s982_s26] sm:$0xff]  ;;  %v593_v1 = vld [vmem:[%s982_s26 + $0x8] sm:$0xff]  ;;  %v595_v2 = vld [vmem:[%s982_s26 + $0x10] sm:$0xff]  ;;  %s607_s16 = sadd.s32 1, %s986_s29  ;;  %s585_s15 = sadd.s32 1, %s990_s15   ;;  %s990_s15 = sphi %s1146_s15, %s585_s15   ;;  %s986_s29 = sphi %s1144_s29, %s1192_s29   ;;  %s982_s26 = sphi %s1191_s26, %s612_s26   ;;  %s978_s21 = sphi %s1190_s21, %s613_s21  }
 0x1ed   : >> { %592 = vst [vmem:[%s978_s21] sm:$0xff] %v591_v0  ;;  %594 = vst [vmem:[%s978_s21 + $0x8] sm:$0xff] %v593_v1  ;;  %v597_v3 = vld [vmem:[%s982_s26 + $0x18] sm:$0xff]  ;;  %v599_v4 = vld [vmem:[%s982_s26 + $0x20] sm:$0xff]  ;;  %p608_p11 = scmp.ge.s32.totalorder %s607_s16, %s1135_s14  ;;  %p584_p12 = scmp.ge.s32.totalorder %s585_s15, %s1135_s14 }
 0x1ee   : >> { %596 = vst [vmem:[%s978_s21 + $0x10] sm:$0xff] %v595_v2  ;;  %v601_v5 = vld [vmem:[%s982_s26 + $0x28] sm:$0xff]  ;;  %598 = vst [vmem:[%s978_s21 + $0x18] sm:$0xff] %v597_v3  ;;  %v603_v6 = vld [vmem:[%s982_s26 + $0x30] sm:$0xff] }
 0x1ef   : >> { %600 = vst [vmem:[%s978_s21 + $0x20] sm:$0xff] %v599_v4  ;;  %602 = vst [vmem:[%s978_s21 + $0x28] sm:$0xff] %v601_v5  ;;  %v605_v7 = vld [vmem:[%s982_s26 + $0x38] sm:$0xff]  ;;  %s1199_s16 = smov (%p608_p11, %s607_s16), 0  ;;  %587 = sbr.rel (!%p584_p12) target bundleno = 492 (0x1ec), region = 130 }
 0x1f0   : >> { %604 = vst [vmem:[%s978_s21 + $0x30] sm:$0xff] %v603_v6  ;;  %606 = vst [vmem:[%s978_s21 + $0x38] sm:$0xff] %v605_v7  ;;  %s771_s17 = sshll.u32 %s1199_s16, 6  ;;  %s1192_s29 = smov %s1199_s16 }
 0x1f1   : >> { %s612_s26 = scalar_lea.vmem %s1104_s8, %s771_s17 [#allocation2]   ;;  %s613_s21 = scalar_lea.vmem %s1129_s12, %s771_s17  }
 0x1f6 PF: > { %s1165_s20 = sand.u32 7, %s1197_s18   ;;  %s782_s23 = sshll.u32 %s1135_s14, 6 }
 0x1f7   : > { %s618_s24 = scalar_lea.vmem %s1104_s8, %s782_s23 [#allocation2]   ;;  %s620_s27 = scalar_lea.vmem %s1129_s12, %s782_s23  }
 0x1f8   : > { %p776_p13 = scmp.le.s32.totalorder %s1165_s20, 0 }
 0x1f9   : > { %s992_s28 = smov (!%p776_p13), %s620_s27   ;;  %s996_s30 = smov (!%p776_p13), %s618_s24  }
 0x1fa   : > { %711 = sbr.rel (%p776_p13) target bundleno = 523 (0x20b), region = 135  ;;  %s1000_s6 = smov (!%p776_p13), 0  }
 0x1fb   : > { %s1004_s7 = smov (!%p776_p13), 0  }
 0x201 LB: >> { %v630_v8 = vld [vmem:[%s998_s30] sm:$0xff]  ;;  %s632_s18 = sadd.s32 1, %s1002_s6  ;;  %s624_s7 = sadd.s32 1, %s1006_s7   ;;  %s1006_s7 = sphi %s1004_s7, %s624_s7   ;;  %s1002_s6 = sphi %s1000_s6, %s1001_s6   ;;  %s998_s30 = sphi %s996_s30, %s637_s30   ;;  %s994_s28 = sphi %s992_s28, %s638_s28  }
 0x202   : >> { %631 = vst [vmem:[%s994_s28] sm:$0xff] %v630_v8  ;;  %p633_p0 = scmp.ge.s32.totalorder %s632_s18, %s1165_s20  ;;  %p623_p1 = scmp.ge.s32.totalorder %s624_s7, %s1165_s20 }
 0x204   : >> { %s1201_s18 = smov (%p633_p0, %s632_s18), 0  ;;  %626 = sbr.rel (!%p623_p1) target bundleno = 513 (0x201), region = 141 }
 0x205   : >> { %s777_s8 = sshll.u32 %s1201_s18, 3  ;;  %s1001_s6 = smov %s1201_s18  }
 0x206   : >> { %s637_s30 = scalar_lea.vmem %s618_s24, %s777_s8 [#allocation2]   ;;  %s638_s28 = scalar_lea.vmem %s620_s27, %s777_s8  }
 0x20b PF: > { %p12_p2 = scmp.ge.s32.totalorder %s1053_s22, 6   ;;  %s1193_s18 = smov %s970_s19 }
 0x20c   : > { %s1194_s19 = smov %s1061_s25  ;;  %s1195_s20 = smov %s1053_s22 }
 0x20d   :  { %14 = sbr.rel (!%p12_p2) target bundleno = 2 (0x2), region = 152 }

</bundles_post_ra>
